<compile_context>
chip_gen: v5e
topology: v5e:2x2
jax: 0.10.0
libtpu: 0.0.40
codegen_flags: <defaults>
</compile_context>

<pallas_src>
import functools
import math

import jax
import jax.numpy as jnp
import numpy as np
from jax.experimental import pallas as pl
from jax.experimental.pallas import tpu as pltpu

NEG_SLOPE = 0.2
_NEG_BIG = -1e30


def _tpu_supports_bf16_eup():
    """bf16 VPU/EUP exists on v6e/v7x; not on v5e and older."""
    try:
        kind = jax.devices()[0].device_kind.lower()
    except Exception:
        return False
    return any(tag in kind for tag in ("v6", "v7"))


# ---------------------------------------------------------------------------
# Kernel 1: fused projection + attention logits (one MXU matmul per row tile)
#   feat @ [W | Wl | Wr]  ->  h (bf16), attn_row (f32), attn_col (f32)
# ---------------------------------------------------------------------------
def proj_kernel(feat_ref, wbig_ref, h_ref, ar_ref, ac_ref, *, hf, num_heads):
    res = jnp.dot(feat_ref[...], wbig_ref[...], preferred_element_type=jnp.float32)
    h_ref[...] = res[:, :hf].astype(h_ref.dtype)              # (TM, HF) bf16
    ar_ref[...] = res[:, hf:hf + num_heads]                   # (TM, H)  f32
    ac_ref[...] = res[:, hf + num_heads:hf + 2 * num_heads]   # (TM, H)  f32


# ---------------------------------------------------------------------------
# Kernel 2: tiled GAT aggregation (online softmax over src tiles, all heads)
# ---------------------------------------------------------------------------
def gat_agg_kernel(adj_ref, ar_ref, act_ref, h_ref, b_ref, o_ref,
                   m_ref, l_ref, acc_ref, *, num_heads, out_feats, bf16_scores):
    k = pl.program_id(1)

    @pl.when(k == 0)
    def _():
        m_ref[...] = jnp.full_like(m_ref, _NEG_BIG)
        l_ref[...] = jnp.zeros_like(l_ref)
        acc_ref[...] = jnp.zeros_like(acc_ref)

    mask = adj_ref[...] > 0                          # (TQ, TK) edge mask, i8 compare
    ar = ar_ref[...]                                 # (TQ, H)  dst logits
    ac_t = act_ref[...]                              # (H, TK)  src logits
    hsrc = h_ref[...]                                # (TK, HF) src features, bf16

    for hd in range(num_heads):
        c0 = hd * out_feats
        c1 = c0 + out_feats

        e = ar[:, hd:hd + 1] + ac_t[hd:hd + 1, :]            # (TQ, TK)
        e = jnp.where(e > 0, e, NEG_SLOPE * e)               # LeakyReLU
        e = jnp.where(mask, e, _NEG_BIG)                     # mask non-edges

        m_old = m_ref[:, hd:hd + 1]                          # (TQ, 1)
        m_new = jnp.maximum(m_old, jnp.max(e, axis=-1, keepdims=True))

        if bf16_scores:
            p = jnp.exp((e - m_new).astype(jnp.bfloat16))    # bf16 EUP (v6e/v7x)
        else:
            p = jnp.exp(e - m_new)                           # f32 (v5e)
        p = jnp.where(mask, p, 0.0)                          # exact match w/ reference

        corr = jnp.exp(m_old - m_new)                        # (TQ, 1)
        l_ref[:, hd:hd + 1] = (
            l_ref[:, hd:hd + 1] * corr
            + jnp.sum(p.astype(jnp.float32), axis=-1, keepdims=True))

        pv = jnp.dot(p.astype(jnp.bfloat16), hsrc[:, c0:c1],
                     preferred_element_type=jnp.float32)     # (TQ, F) f32 acc
        acc_ref[:, c0:c1] = acc_ref[:, c0:c1] * corr + pv
        m_ref[:, hd:hd + 1] = m_new

    @pl.when(k == pl.num_programs(1) - 1)
    def _():
        # Normalize AFTER the matmul: EUP reciprocal + O(TQ*F) scale.
        inv_l = pl.reciprocal(jnp.maximum(l_ref[...], 1e-30), approx=True)  # (TQ, H)
        bias = b_ref[...]
        for hd in range(num_heads):
            c0 = hd * out_feats
            c1 = c0 + out_feats
            o_ref[:, c0:c1] = (acc_ref[:, c0:c1] * inv_l[:, hd:hd + 1]
                               + bias[:, c0:c1]).astype(o_ref.dtype)


# ---------------------------------------------------------------------------
# Python wrapper
# ---------------------------------------------------------------------------
def gatconv_forward(feat, W, attn_l, attn_r, bias, adj_i8, num_heads, out_feats,
                    *, tm=512, tq=256, tk=256, bf16_scores=None):
    N, in_feats = feat.shape
    HF = num_heads * out_feats

    # Clamp tiles to the problem size; keep them tileable.
    tm = min(tm, N)
    tq = min(tq, N)
    tk = min(tk, N)
    assert N % tm == 0 and N % tq == 0 and N % tk == 0, "N must be tileable"
    # NOTE(perf): sweep tq/tk in {256, 512}; on v7x re-derive the VMEM budget
    # against the 32 MiB scoped limit (physical 64 MiB) and keep N//tq >= 2 so
    # both TensorCores get dst tiles.

    if bf16_scores is None:
        bf16_scores = _tpu_supports_bf16_eup()

    # Fold attention-logit reductions into the projection weight (host-side,
    # tiny): attn_row = feat @ Wl with Wl[k,h] = sum_f W[k, h*F+f] * attn_l[h,f].
    W3 = W.reshape(in_feats, num_heads, out_feats)
    Wl = jnp.einsum("khf,hf->kh", W3, attn_l[0])
    Wr = jnp.einsum("khf,hf->kh", W3, attn_r[0])
    Wbig = jnp.concatenate([W, Wl, Wr], axis=1)              # (in_feats, HF + 2H)

    h2d, attn_row, attn_col = pl.pallas_call(
        functools.partial(proj_kernel, hf=HF, num_heads=num_heads),
        grid=(N // tm,),
        in_specs=[
            pl.BlockSpec((tm, in_feats), lambda i: (i, 0)),
            pl.BlockSpec((in_feats, HF + 2 * num_heads), lambda i: (0, 0)),
        ],
        out_specs=(
            pl.BlockSpec((tm, HF), lambda i: (i, 0)),
            pl.BlockSpec((tm, num_heads), lambda i: (i, 0)),
            pl.BlockSpec((tm, num_heads), lambda i: (i, 0)),
        ),
        out_shape=(
            jax.ShapeDtypeStruct((N, HF), jnp.bfloat16),     # h in bf16
            jax.ShapeDtypeStruct((N, num_heads), jnp.float32),
            jax.ShapeDtypeStruct((N, num_heads), jnp.float32),
        ),
        compiler_params=pltpu.CompilerParams(dimension_semantics=("parallel",)),
    )(feat, Wbig)

    # Tiny (N, H) -> (H, N) copy so kernel 2 gets a (1, TK) src-logit row per
    # head without an in-kernel transpose (N*H*4 bytes — negligible).
    attn_col_t = attn_col.T
    bias2d = bias.reshape(1, HF)

    out2d = pl.pallas_call(
        functools.partial(gat_agg_kernel, num_heads=num_heads,
                          out_feats=out_feats, bf16_scores=bf16_scores),
        grid=(N // tq, N // tk),
        in_specs=[
            pl.BlockSpec((tq, tk), lambda q, k: (q, k)),           # adj (int8)
            pl.BlockSpec((tq, num_heads), lambda q, k: (q, 0)),    # attn_row
            pl.BlockSpec((num_heads, tk), lambda q, k: (0, k)),    # attn_col^T
            pl.BlockSpec((tk, HF), lambda q, k: (k, 0)),           # h (src rows, bf16)
            pl.BlockSpec((1, HF), lambda q, k: (0, 0)),            # bias
        ],
        out_specs=pl.BlockSpec((tq, HF), lambda q, k: (q, 0)),     # lane-dense out
        out_shape=jax.ShapeDtypeStruct((N, HF), jnp.float32),
        scratch_shapes=[
            pltpu.VMEM((tq, num_heads), jnp.float32),   # running max
            pltpu.VMEM((tq, num_heads), jnp.float32),   # running denom
            pltpu.VMEM((tq, HF), jnp.float32),          # accumulator
        ],
        compiler_params=pltpu.CompilerParams(
            dimension_semantics=("parallel", "arbitrary"),
            vmem_limit_bytes=32 * 1024 * 1024),
    )(adj_i8, attn_row, attn_col_t, h2d, bias2d)

    return out2d.reshape(N, num_heads, out_feats)


# ---------------------------------------------------------------------------
# Pure-JAX reference for correctness checking
# ---------------------------------------------------------------------------
def gatconv_reference(feat, W, attn_l, attn_r, bias, adj, num_heads, out_feats):
    N = feat.shape[0]
    h = (feat @ W).reshape(N, num_heads, out_feats)
    attn_row = (attn_l * h).sum(-1)                # (N, H)
    attn_col = (attn_r * h).sum(-1)                # (N, H)
    e = attn_row[:, None, :] + attn_col[None, :, :]       # (N, N, H), [dst, src, head]
    e = jnp.where(e > 0, e, NEG_SLOPE * e)
    mask = adj[:, :, None] > 0
    masked = jnp.where(mask, e, -1e30)
    m = jnp.max(masked, axis=1, keepdims=True)
    p = jnp.exp(masked - m) * adj[:, :, None]
    denom = jnp.maximum(jnp.sum(p, axis=1, keepdims=True), 1e-30)
    alpha = p / denom
    rst = jnp.einsum("ijh,jhf->ihf", alpha, h)
    return rst + bias.reshape(1, num_heads, out_feats)


# ---------------------------------------------------------------------------
# Deterministic parameter init (matches the module's __init__ shapes)
# ---------------------------------------------------------------------------
def xavier_normal(key, shape, fan_in, fan_out, gain):
    std = gain * math.sqrt(2.0 / (fan_in + fan_out))
    return std * jax.random.normal(key, shape, dtype=jnp.float32)


if __name__ == "__main__":
    N, in_feats, out_feats, num_heads = 256, 16, 8, 4
    HF = num_heads * out_feats
    gain = math.sqrt(2.0)  # nn.init.calculate_gain('relu')

    key = jax.random.PRNGKey(0)
    k_feat, k_w, k_l, k_r = jax.random.split(key, 4)

    feat = jax.random.normal(k_feat, (N, in_feats), dtype=jnp.float32)
    W = xavier_normal(k_w, (in_feats, HF), in_feats, HF, gain)
    attn_l = xavier_normal(k_l, (1, num_heads, out_feats),
                           num_heads * out_feats, out_feats, gain)
    attn_r = xavier_normal(k_r, (1, num_heads, out_feats),
                           num_heads * out_feats, out_feats, gain)
    bias = jnp.zeros((HF,), dtype=jnp.float32)

    # Deterministic small graph in CSR form: self-loop + next two ring neighbors.
    row_ptr = np.zeros(N + 1, dtype=np.int32)
    col_ind = []
    for i in range(N):
        nbrs = [i, (i + 1) % N, (i + 2) % N]
        col_ind.extend(nbrs)
        row_ptr[i + 1] = row_ptr[i] + len(nbrs)
    col_ind = np.array(col_ind, dtype=np.int32)

    # Densify CSR adjacency (row = destination, col = source neighbor), int8.
    adj_np = np.zeros((N, N), dtype=np.int8)
    for i in range(N):
        adj_np[i, col_ind[row_ptr[i]:row_ptr[i + 1]]] = 1
    adj_i8 = jnp.asarray(adj_np)
    adj_f32 = jnp.asarray(adj_np.astype(np.float32))

    out = gatconv_forward(feat, W, attn_l, attn_r, bias, adj_i8,
                          num_heads, out_feats)
    out = jax.block_until_ready(out)

    ref = gatconv_reference(feat, W, attn_l, attn_r, bias, adj_f32,
                            num_heads, out_feats)
    # bf16 score/value MXU inputs + approx EUP reciprocal => ~1e-2 rel deviation.
    np.testing.assert_allclose(np.asarray(out), np.asarray(ref), rtol=3e-2, atol=3e-2)

    print("KERNEL_OK")
</pallas_src>

<mosaic_0001>
module attributes {stable_mosaic.version = 11 : i64} {
  func.func @proj_kernel(%arg0: i32, %arg1: memref<256x16xf32, #tpu.memory_space<vmem>>, %arg2: memref<16x40xf32, #tpu.memory_space<vmem>>, %arg3: memref<256x32xbf16, #tpu.memory_space<vmem>>, %arg4: memref<256x4xf32, #tpu.memory_space<vmem>>, %arg5: memref<256x4xf32, #tpu.memory_space<vmem>>) attributes {dimension_semantics = [#tpu.dimension_semantics<parallel>], iteration_bounds = array<i64: 1>, scalar_prefetch = 0 : i64, scratch_operands = 0 : i64, tpu.core_type = #tpu.core_type<tc>, window_params = [{transform_indices = @transform_0, window_bounds = array<i64: 256, 16>}, {pipeline_mode = #tpu.pipeline_mode<synchronous>, transform_indices = @transform_1, window_bounds = array<i64: 16, 40>}, {transform_indices = @transform_2, window_bounds = array<i64: 256, 32>}, {transform_indices = @transform_3, window_bounds = array<i64: 256, 4>}, {transform_indices = @transform_4, window_bounds = array<i64: 256, 4>}]} {
    %c0 = arith.constant 0 : index
    %c0_0 = arith.constant 0 : index
    %0 = vector.load %arg1[%c0, %c0_0] : memref<256x16xf32, #tpu.memory_space<vmem>>, vector<256x16xf32>
    %c0_1 = arith.constant 0 : index
    %c0_2 = arith.constant 0 : index
    %1 = vector.load %arg2[%c0_1, %c0_2] : memref<16x40xf32, #tpu.memory_space<vmem>>, vector<16x40xf32>
    %cst = arith.constant dense<0.000000e+00> : vector<256x40xf32>
    %2 = tpu.matmul %0, %1, %cst {dimension_numbers = #tpu.dot_dimension_numbers<[1], [0], [0], [1], [0, 0, 1, 1], [], []>} : vector<256x16xf32>, vector<16x40xf32>, vector<256x40xf32> -> vector<256x40xf32>
    %3 = vector.extract_strided_slice %2 {offsets = [0, 0], sizes = [256, 32], strides = [1, 1]} : vector<256x40xf32> to vector<256x32xf32>
    %4 = arith.truncf %3 : vector<256x32xf32> to vector<256x32xbf16>
    %c0_3 = arith.constant 0 : index
    %c0_4 = arith.constant 0 : index
    %5 = vector.load %arg3[%c0_3, %c0_4] : memref<256x32xbf16, #tpu.memory_space<vmem>>, vector<256x32xbf16>
    tpu.vector_store %arg3[%c0_3, %c0_4], %4 {strides = array<i32>} : memref<256x32xbf16, #tpu.memory_space<vmem>>, vector<256x32xbf16>,
    %6 = vector.extract_strided_slice %2 {offsets = [0, 32], sizes = [256, 4], strides = [1, 1]} : vector<256x40xf32> to vector<256x4xf32>
    %c0_5 = arith.constant 0 : index
    %c0_6 = arith.constant 0 : index
    %7 = vector.load %arg4[%c0_5, %c0_6] : memref<256x4xf32, #tpu.memory_space<vmem>>, vector<256x4xf32>
    tpu.vector_store %arg4[%c0_5, %c0_6], %6 {strides = array<i32>} : memref<256x4xf32, #tpu.memory_space<vmem>>, vector<256x4xf32>,
    %8 = vector.extract_strided_slice %2 {offsets = [0, 36], sizes = [256, 4], strides = [1, 1]} : vector<256x40xf32> to vector<256x4xf32>
    %c0_7 = arith.constant 0 : index
    %c0_8 = arith.constant 0 : index
    %9 = vector.load %arg5[%c0_7, %c0_8] : memref<256x4xf32, #tpu.memory_space<vmem>>, vector<256x4xf32>
    tpu.vector_store %arg5[%c0_7, %c0_8], %8 {strides = array<i32>} : memref<256x4xf32, #tpu.memory_space<vmem>>, vector<256x4xf32>,
    return
  }
  func.func @transform_0(%arg0: i32) -> (i32, i32) {
    %c0_i32 = arith.constant 0 : i32
    %c0_i32_0 = arith.constant 0 : i32
    return %arg0, %c0_i32 : i32, i32
  }
  func.func @transform_1(%arg0: i32) -> (i32, i32) {
    %c0_i32 = arith.constant 0 : i32
    %c0_i32_0 = arith.constant 0 : i32
    %c0_i32_1 = arith.constant 0 : i32
    return %c0_i32, %c0_i32_0 : i32, i32
  }
  func.func @transform_2(%arg0: i32) -> (i32, i32) {
    %c0_i32 = arith.constant 0 : i32
    %c0_i32_0 = arith.constant 0 : i32
    return %arg0, %c0_i32 : i32, i32
  }
  func.func @transform_3(%arg0: i32) -> (i32, i32) {
    %c0_i32 = arith.constant 0 : i32
    %c0_i32_0 = arith.constant 0 : i32
    return %arg0, %c0_i32 : i32, i32
  }
  func.func @transform_4(%arg0: i32) -> (i32, i32) {
    %c0_i32 = arith.constant 0 : i32
    %c0_i32_0 = arith.constant 0 : i32
    return %arg0, %c0_i32 : i32, i32
  }
}

</mosaic_0001>

<bundles_post_ra>
// kernel: tpu_custom_call.1
= control target key start
LH: loop header
LB: loop body
LE: loop exit
PB: predicated region body
PF: predicated region fallthrough
CT: control target
= control target key end

     0   :  { %vm48_vm0 = vcmask 130048   ;;  %vm290_vm1 = vcmask 257024   ;;  %s664_s28 = smov 92   ;;  %s665_s29 = smov 96   ;;  %vm451_vm2 = vcmask 31744   ;;  %s1309_s1 = inlined_call_operand.vmem [shape: f32[16,40], index: 1, kind: input, shape index: {}]   ;;  %s1310_s0 = inlined_call_operand.vmem [shape: f32[256,16], index: 0, kind: input, shape index: {}]   ;;  %s1311_s2 = inlined_call_operand.vmem [shape: bf16[256,32], index: 2, kind: output, shape index: {0}]   ;;  %s1312_s3 = inlined_call_operand.vmem [shape: f32[256,4], index: 3, kind: output, shape index: {1}]   ;;  %s1313_s4 = inlined_call_operand.vmem [shape: f32[256,4], index: 4, kind: output, shape index: {2}]  }
   0x1   :  { %v47_v0 = vld [vmem:[%s1309_s1 + $0x8] sm:$0xff]  ;;  %v46_v1 = vld [vmem:[%s1309_s1] sm:$0xff]  ;;  %v16_v10 = vld [vmem:[%s1310_s0 + $0x10] sm:$0xff] }
   0x2   :  { %159 = vmatpush.msra.mxu0 %v47_v0  ;;  %656 = vmatpush.msra.mxu1 %v47_v0  ;;  %v14_v2 = vld [vmem:[%s1310_s0] sm:$0xff]  ;;  %v15_v6 = vld [vmem:[%s1310_s0 + $0x8] sm:$0xff]  ;;  %v24_v11 = vld [vmem:[%s1310_s0 + $0x50] sm:$0xff] }
   0x3   :  { %v22_v3 = vld [vmem:[%s1310_s0 + $0x40] sm:$0xff]  ;;  %657 = vmatpush.msra.mxu2 %v47_v0  ;;  %658 = vmatpush.msra.mxu3 %v47_v0  ;;  %v23_v7 = vld [vmem:[%s1310_s0 + $0x48] sm:$0xff]  ;;  %v40_v12 = vld [vmem:[%s1310_s0 + $0xd0] sm:$0xff] }
   0x4   :  { %160 = vmatpush.msra.mxu0 %v46_v1  ;;  %659 = vmatpush.msra.mxu1 %v46_v1  ;;  %v30_v4 = vld [vmem:[%s1310_s0 + $0x80] sm:$0xff]  ;;  %v39_v8 = vld [vmem:[%s1310_s0 + $0xc8] sm:$0xff]  ;;  %v32_v13 = vld [vmem:[%s1310_s0 + $0x90] sm:$0xff] }
   0x5   :  { %v38_v5 = vld [vmem:[%s1310_s0 + $0xc0] sm:$0xff]  ;;  %624 = vmatmul.msk.f32.vlgmr.msra.gmra.mxu0 %vm48_vm0, %v14_v2  ;;  %632 = vmatmul.msk.f32.vlgmr.msra.gmra.mxu1 %vm48_vm0, %v22_v3  ;;  %v31_v9 = vld [vmem:[%s1310_s0 + $0x88] sm:$0xff]  ;;  %v25_v14 = vld [vmem:[%s1310_s0 + $0x58] sm:$0xff] }
   0x6   :  { %660 = vmatpush.msra.mxu2 %v46_v1  ;;  %661 = vmatpush.msra.mxu3 %v46_v1  ;;  %v17_v15 = vld [vmem:[%s1310_s0 + $0x18] sm:$0xff]  ;;  %v18_v18 = vld [vmem:[%s1310_s0 + $0x20] sm:$0xff]  ;;  %v19_v22 = vld [vmem:[%s1310_s0 + $0x28] sm:$0xff] }
   0x7   :  { %640 = vmatmul.msk.f32.vlgmr.msra.gmra.mxu2 %vm48_vm0, %v30_v4  ;;  %648 = vmatmul.msk.f32.vlgmr.msra.gmra.mxu3 %vm48_vm0, %v38_v5  ;;  %v41_v16 = vld [vmem:[%s1310_s0 + $0xd8] sm:$0xff]  ;;  %v26_v19 = vld [vmem:[%s1310_s0 + $0x60] sm:$0xff]  ;;  %v27_v23 = vld [vmem:[%s1310_s0 + $0x68] sm:$0xff] }
   0x8   :  { %v33_v17 = vld [vmem:[%s1310_s0 + $0x98] sm:$0xff]  ;;  %v42_v20 = vld [vmem:[%s1310_s0 + $0xe0] sm:$0xff]  ;;  %v43_v24 = vld [vmem:[%s1310_s0 + $0xe8] sm:$0xff] }
   0x9   :  { %v34_v21 = vld [vmem:[%s1310_s0 + $0xa0] sm:$0xff]  ;;  %v35_v25 = vld [vmem:[%s1310_s0 + $0xa8] sm:$0xff]  ;;  %v28_v26 = vld [vmem:[%s1310_s0 + $0x70] sm:$0xff] }
   0xa   :  { %v36_v27 = vld [vmem:[%s1310_s0 + $0xb0] sm:$0xff]  ;;  %v21_v30 = vld [vmem:[%s1310_s0 + $0x38] sm:$0xff] }
   0xb   :  { %v20_v28 = vld [vmem:[%s1310_s0 + $0x30] sm:$0xff]  ;;  %v45_v31 = vld [vmem:[%s1310_s0 + $0xf8] sm:$0xff] }
   0xc   :  { %v44_v29 = vld [vmem:[%s1310_s0 + $0xf0] sm:$0xff]  ;;  %v29_v32 = vld [vmem:[%s1310_s0 + $0x78] sm:$0xff] }
   0xd   :  { %625 = vmatmul.msk.f32.gmra.mxu0 %vm48_vm0, %v15_v6  ;;  %633 = vmatmul.msk.f32.gmra.mxu1 %vm48_vm0, %v23_v7  ;;  %v37_v33 = vld [vmem:[%s1310_s0 + $0xb8] sm:$0xff] }
   0xf   :  { %649 = vmatmul.msk.f32.gmra.mxu3 %vm48_vm0, %v39_v8  ;;  %641 = vmatmul.msk.f32.gmra.mxu2 %vm48_vm0, %v31_v9 }
  0x15   :  { %626 = vmatmul.msk.f32.gmra.mxu0 %vm48_vm0, %v16_v10  ;;  %634 = vmatmul.msk.f32.gmra.mxu1 %vm48_vm0, %v24_v11 }
  0x17   :  { %650 = vmatmul.msk.f32.gmra.mxu3 %vm48_vm0, %v40_v12  ;;  %642 = vmatmul.msk.f32.gmra.mxu2 %vm48_vm0, %v32_v13 }
  0x1d   :  { %635 = vmatmul.msk.f32.gmra.mxu1 %vm48_vm0, %v25_v14  ;;  %627 = vmatmul.msk.f32.gmra.mxu0 %vm48_vm0, %v17_v15 }
  0x1f   :  { %651 = vmatmul.msk.f32.gmra.mxu3 %vm48_vm0, %v41_v16  ;;  %643 = vmatmul.msk.f32.gmra.mxu2 %vm48_vm0, %v33_v17 }
  0x25   :  { %628 = vmatmul.msk.f32.gmra.mxu0 %vm48_vm0, %v18_v18  ;;  %636 = vmatmul.msk.f32.gmra.mxu1 %vm48_vm0, %v26_v19 }
  0x27   :  { %652 = vmatmul.msk.f32.gmra.mxu3 %vm48_vm0, %v42_v20  ;;  %644 = vmatmul.msk.f32.gmra.mxu2 %vm48_vm0, %v34_v21 }
  0x2d   :  { %629 = vmatmul.msk.f32.gmra.mxu0 %vm48_vm0, %v19_v22  ;;  %637 = vmatmul.msk.f32.gmra.mxu1 %vm48_vm0, %v27_v23 }
  0x2f   :  { %653 = vmatmul.msk.f32.gmra.mxu3 %vm48_vm0, %v43_v24  ;;  %645 = vmatmul.msk.f32.gmra.mxu2 %vm48_vm0, %v35_v25 }
  0x35   :  { %638 = vmatmul.msk.f32.gmra.mxu1 %vm48_vm0, %v28_v26  ;;  %630 = vmatmul.msk.f32.gmra.mxu0 %vm48_vm0, %v20_v28 }
  0x37   :  { %646 = vmatmul.msk.f32.gmra.mxu2 %vm48_vm0, %v36_v27  ;;  %654 = vmatmul.msk.f32.gmra.mxu3 %vm48_vm0, %v44_v29 }
  0x3d   :  { %631 = vmatmul.msk.f32.gmra.mxu0 %vm48_vm0, %v21_v30  ;;  %639 = vmatmul.msk.f32.gmra.mxu1 %vm48_vm0, %v29_v32 }
  0x3f   :  { %655 = vmatmul.msk.f32.gmra.mxu3 %vm48_vm0, %v45_v31  ;;  %647 = vmatmul.msk.f32.gmra.mxu2 %vm48_vm0, %v37_v33 }
  0x82   :  { %v162_v34 = vpop.f32.mrf.mxu0  ;;  %v186_v35 = vpop.f32.mrf.mxu1 }
  0x83   :  { %v258_v36 = vpack.c.bf16 %v162_v34, %v162_v34  ;;  %v266_v37 = vpack.c.bf16 %v186_v35, %v186_v35  ;;  %500 = vrot.lane.b32.xlu1 %v186_v35, %s664_s28  ;;  %371 = vrot.lane.b32.xlu2 %v186_v35, %s665_s29 }
  0x84   :  { %355 = vrot.lane.b32.xlu0 %v162_v34, %s665_s29 }
  0x85   :  { %291 = vst.msk [vmem:[%s1311_s2] sm:$0xf] %vm290_vm1, %v258_v36 }
  0x86   :  { %299 = vst.msk [vmem:[%s1311_s2 + $0x20] sm:$0xf] %vm290_vm1, %v266_v37 }
  0x8a   :  { %v210_v38 = vpop.f32.mrf.mxu2  ;;  %v234_v39 = vpop.f32.mrf.mxu3 }
  0x8b   :  { %v274_v40 = vpack.c.bf16 %v210_v38, %v210_v38  ;;  %v282_v41 = vpack.c.bf16 %v234_v39, %v234_v39  ;;  %387 = vrot.lane.b32.xlu1 %v210_v38, %s665_s29  ;;  %484 = vrot.lane.b32.xlu2 %v162_v34, %s664_s28  ;;  %v165_v42 = vpop.f32.mrf.mxu0  ;;  %v189_v43 = vpop.f32.mrf.mxu1 }
  0x8c   :  { %403 = vrot.lane.b32.xlu0 %v234_v39, %s665_s29  ;;  %v259_v44 = vpack.c.bf16 %v165_v42, %v165_v42  ;;  %v267_v45 = vpack.c.bf16 %v189_v43, %v189_v43 }
  0x8d   :  { %307 = vst.msk [vmem:[%s1311_s2 + $0x40] sm:$0xf] %vm290_vm1, %v274_v40 }
  0x8e   :  { %315 = vst.msk [vmem:[%s1311_s2 + $0x60] sm:$0xf] %vm290_vm1, %v282_v41 }
  0x8f   :  { %292 = vst.msk [vmem:[%s1311_s2 + $0x4] sm:$0xf] %vm290_vm1, %v259_v44 }
  0x90   :  { %300 = vst.msk [vmem:[%s1311_s2 + $0x24] sm:$0xf] %vm290_vm1, %v267_v45 }
  0x92   :  { %v237_v46 = vpop.f32.mrf.mxu3  ;;  %v213_v47 = vpop.f32.mrf.mxu2 }
  0x93   :  { %v283_v48 = vpack.c.bf16 %v237_v46, %v237_v46  ;;  %405 = vrot.lane.b32.xlu1 %v237_v46, %s665_s29  ;;  %532 = vrot.lane.b32.xlu2 %v234_v39, %s664_s28  ;;  %v275_v49 = vpack.c.bf16 %v213_v47, %v213_v47  ;;  %v168_v50 = vpop.f32.mrf.mxu0  ;;  %v192_v51 = vpop.f32.mrf.mxu1 }
  0x94   :  { %516 = vrot.lane.b32.xlu0 %v210_v38, %s664_s28  ;;  %v260_v52 = vpack.c.bf16 %v168_v50, %v168_v50  ;;  %v268_v53 = vpack.c.bf16 %v192_v51, %v192_v51 }
  0x95   :  { %316 = vst.msk [vmem:[%s1311_s2 + $0x64] sm:$0xf] %vm290_vm1, %v283_v48 }
  0x96   :  { %308 = vst.msk [vmem:[%s1311_s2 + $0x44] sm:$0xf] %vm290_vm1, %v275_v49 }
  0x97   :  { %293 = vst.msk [vmem:[%s1311_s2 + $0x8] sm:$0xf] %vm290_vm1, %v260_v52 }
  0x98   :  { %301 = vst.msk [vmem:[%s1311_s2 + $0x28] sm:$0xf] %vm290_vm1, %v268_v53 }
  0x9a   :  { %v240_v54 = vpop.f32.mrf.mxu3  ;;  %v216_v55 = vpop.f32.mrf.mxu2 }
  0x9b   :  { %518 = vrot.lane.b32.xlu1 %v213_v47, %s664_s28  ;;  %502 = vrot.lane.b32.xlu2 %v189_v43, %s664_s28  ;;  %v284_v56 = vpack.c.bf16 %v240_v54, %v240_v54  ;;  %v276_v57 = vpack.c.bf16 %v216_v55, %v216_v55  ;;  %v195_v58 = vpop.f32.mrf.mxu1  ;;  %v171_v60 = vpop.f32.mrf.mxu0 }
  0x9c   :  { %357 = vrot.lane.b32.xlu0 %v165_v42, %s665_s29  ;;  %v269_v59 = vpack.c.bf16 %v195_v58, %v195_v58  ;;  %v261_v61 = vpack.c.bf16 %v171_v60, %v171_v60 }
  0x9d   :  { %317 = vst.msk [vmem:[%s1311_s2 + $0x68] sm:$0xf] %vm290_vm1, %v284_v56 }
  0x9e   :  { %309 = vst.msk [vmem:[%s1311_s2 + $0x48] sm:$0xf] %vm290_vm1, %v276_v57 }
  0x9f   :  { %302 = vst.msk [vmem:[%s1311_s2 + $0x2c] sm:$0xf] %vm290_vm1, %v269_v59 }
  0xa0   :  { %294 = vst.msk [vmem:[%s1311_s2 + $0xc] sm:$0xf] %vm290_vm1, %v261_v61 }
  0xa2   :  { %v243_v62 = vpop.f32.mrf.mxu3  ;;  %v219_v1 = vpop.f32.mrf.mxu2 }
  0xa3   :  { %389 = vrot.lane.b32.xlu2 %v213_v47, %s665_s29  ;;  %359 = vrot.lane.b32.xlu1 %v168_v50, %s665_s29  ;;  %v285_v63 = vpack.c.bf16 %v243_v62, %v243_v62  ;;  %v174_v0 = vpop.f32.mrf.mxu0  ;;  %v277_v3 = vpack.c.bf16 %v219_v1, %v219_v1  ;;  %v198_v4 = vpop.f32.mrf.mxu1 }
  0xa4   :  { %373 = vrot.lane.b32.xlu0 %v189_v43, %s665_s29  ;;  %v262_v2 = vpack.c.bf16 %v174_v0, %v174_v0  ;;  %v270_v6 = vpack.c.bf16 %v198_v4, %v198_v4 }
  0xa5   :  { %318 = vst.msk [vmem:[%s1311_s2 + $0x6c] sm:$0xf] %vm290_vm1, %v285_v63 }
  0xa6   :  { %295 = vst.msk [vmem:[%s1311_s2 + $0x10] sm:$0xf] %vm290_vm1, %v262_v2 }
  0xa7   :  { %310 = vst.msk [vmem:[%s1311_s2 + $0x4c] sm:$0xf] %vm290_vm1, %v277_v3 }
  0xa8   :  { %303 = vst.msk [vmem:[%s1311_s2 + $0x30] sm:$0xf] %vm290_vm1, %v270_v6 }
  0xaa   :  { %v246_v5 = vpop.f32.mrf.mxu3  ;;  %v222_v8 = vpop.f32.mrf.mxu2 }
  0xab   :  { %407 = vrot.lane.b32.xlu2 %v240_v54, %s665_s29  ;;  %375 = vrot.lane.b32.xlu1 %v192_v51, %s665_s29  ;;  %v286_v7 = vpack.c.bf16 %v246_v5, %v246_v5  ;;  %v278_v9 = vpack.c.bf16 %v222_v8, %v222_v8  ;;  %v177_v10 = vpop.f32.mrf.mxu0  ;;  %v201_v11 = vpop.f32.mrf.mxu1 }
  0xac   :  { %486 = vrot.lane.b32.xlu0 %v165_v42, %s664_s28  ;;  %v263_v12 = vpack.c.bf16 %v177_v10, %v177_v10  ;;  %v271_v13 = vpack.c.bf16 %v201_v11, %v201_v11 }
  0xad   :  { %319 = vst.msk [vmem:[%s1311_s2 + $0x70] sm:$0xf] %vm290_vm1, %v286_v7 }
  0xae   :  { %311 = vst.msk [vmem:[%s1311_s2 + $0x50] sm:$0xf] %vm290_vm1, %v278_v9 }
  0xaf   :  { %296 = vst.msk [vmem:[%s1311_s2 + $0x14] sm:$0xf] %vm290_vm1, %v263_v12 }
  0xb0   :  { %304 = vst.msk [vmem:[%s1311_s2 + $0x34] sm:$0xf] %vm290_vm1, %v271_v13 }
  0xb2   :  { %v943_v14 = vpop.f32.mrf.mxu3  ;;  %v225_v17 = vpop.f32.mrf.mxu2 }
  0xb3   :  { %520 = vrot.lane.b32.xlu2 %v216_v55, %s664_s28  ;;  %488 = vrot.lane.b32.xlu1 %v168_v50, %s664_s28  ;;  %v287_v15 = vpack.c.bf16 %v943_v14, %v943_v14  ;;  %v954_v16 = vpop.f32.mrf.mxu1  ;;  %v279_v19 = vpack.c.bf16 %v225_v17, %v225_v17  ;;  %v180_v23 = vpop.f32.mrf.mxu0 }
  0xb4   :  { %534 = vrot.lane.b32.xlu0 %v237_v46, %s664_s28  ;;  %v272_v18 = vpack.c.bf16 %v954_v16, %v954_v16  ;;  %v264_v24 = vpack.c.bf16 %v180_v23, %v180_v23 }
  0xb5   :  { %320 = vst.msk [vmem:[%s1311_s2 + $0x74] sm:$0xf] %vm290_vm1, %v287_v15 }
  0xb6   :  { %305 = vst.msk [vmem:[%s1311_s2 + $0x38] sm:$0xf] %vm290_vm1, %v272_v18 }
  0xb7   :  { %312 = vst.msk [vmem:[%s1311_s2 + $0x54] sm:$0xf] %vm290_vm1, %v279_v19 }
  0xb8   :  { %297 = vst.msk [vmem:[%s1311_s2 + $0x18] sm:$0xf] %vm290_vm1, %v264_v24 }
  0xba   :  { %v973_v21 = vpop.f32.mrf.mxu2  ;;  %v992_v26 = vpop.f32.mrf.mxu3 }
  0xbb   :  { %377 = vrot.lane.b32.xlu2 %v195_v58, %s665_s29  ;;  %536 = vrot.lane.b32.xlu1 %v240_v54, %s664_s28  ;;  %v280_v22 = vpack.c.bf16 %v973_v21, %v973_v21  ;;  %v996_v27 = vpop.f32.mrf.mxu0  ;;  %v288_v28 = vpack.c.bf16 %v992_v26, %v992_v26  ;;  %v207_v33 = vpop.f32.mrf.mxu1 }
  0xbc   :  { %504 = vrot.lane.b32.xlu0 %v192_v51, %s664_s28  ;;  %v265_v29 = vpack.c.bf16 %v996_v27, %v996_v27  ;;  %v273_v36 = vpack.c.bf16 %v207_v33, %v207_v33 }
  0xbd   :  { %313 = vst.msk [vmem:[%s1311_s2 + $0x58] sm:$0xf] %vm290_vm1, %v280_v22 }
  0xbe   :  { %321 = vst.msk [vmem:[%s1311_s2 + $0x78] sm:$0xf] %vm290_vm1, %v288_v28 }
  0xbf   :  { %298 = vst.msk [vmem:[%s1311_s2 + $0x1c] sm:$0xf] %vm290_vm1, %v265_v29 }
  0xc0   :  { %306 = vst.msk [vmem:[%s1311_s2 + $0x3c] sm:$0xf] %vm290_vm1, %v273_v36 }
  0xc2   :  { %v1015_v31 = vpop.f32.mrf.mxu3  ;;  %v231_v38 = vpop.f32.mrf.mxu2 }
  0xc3   :  { %490 = vrot.lane.b32.xlu2 %v171_v60, %s664_s28  ;;  %361 = vrot.lane.b32.xlu1 %v171_v60, %s665_s29  ;;  %v289_v32 = vpack.c.bf16 %v1015_v31, %v1015_v31  ;;  %v281_v39 = vpack.c.bf16 %v231_v38, %v231_v38 }
  0xc4   :  { %391 = vrot.lane.b32.xlu0 %v216_v55, %s665_s29 }
  0xc5   :  { %322 = vst.msk [vmem:[%s1311_s2 + $0x7c] sm:$0xf] %vm290_vm1, %v289_v32 }
  0xc6   :  { %314 = vst.msk [vmem:[%s1311_s2 + $0x5c] sm:$0xf] %vm290_vm1, %v281_v39 }
  0xcb   :  { %538 = vrot.lane.b32.xlu2 %v243_v62, %s664_s28  ;;  %506 = vrot.lane.b32.xlu1 %v195_v58, %s664_s28 }
  0xcc   :  { %409 = vrot.lane.b32.xlu0 %v243_v62, %s665_s29 }
  0xd3   :  { %393 = vrot.lane.b32.xlu1 %v219_v1, %s665_s29  ;;  %363 = vrot.lane.b32.xlu2 %v174_v0, %s665_s29 }
  0xd4   :  { %522 = vrot.lane.b32.xlu0 %v219_v1, %s664_s28 }
  0xdb   :  { %411 = vrot.lane.b32.xlu1 %v246_v5, %s665_s29  ;;  %508 = vrot.lane.b32.xlu2 %v198_v4, %s664_s28 }
  0xdc   :  { %379 = vrot.lane.b32.xlu0 %v198_v4, %s665_s29 }
  0xdd   :  { %v372_v20 = vpop.permute.xlu2 %371 }
  0xde   :  { %460 = vst.msk [vmem:[%s1312_s3 + $0x40] sm:$0xff] %vm451_vm2, %v372_v20 }
  0xe3   :  { %524 = vrot.lane.b32.xlu1 %v222_v8, %s664_s28  ;;  %395 = vrot.lane.b32.xlu2 %v222_v8, %s665_s29 }
  0xe4   :  { %492 = vrot.lane.b32.xlu0 %v174_v0, %s664_s28 }
  0xe5   :  { %v485_v25 = vpop.permute.xlu2 %484 }
  0xe6   :  { %580 = vst.msk [vmem:[%s1313_s4] sm:$0xff] %vm451_vm2, %v485_v25 }
  0xeb   :  { %381 = vrot.lane.b32.xlu1 %v201_v11, %s665_s29  ;;  %365 = vrot.lane.b32.xlu2 %v177_v10, %s665_s29 }
  0xec   :  { %540 = vrot.lane.b32.xlu0 %v246_v5, %s664_s28 }
  0xed   :  { %v533_v30 = vpop.permute.xlu2 %532 }
  0xee   :  { %604 = vst.msk [vmem:[%s1313_s4 + $0xc0] sm:$0xff] %vm451_vm2, %v533_v30 }
  0xf3   :  { %494 = vrot.lane.b32.xlu1 %v177_v10, %s664_s28  ;;  %413 = vrot.lane.b32.xlu2 %v943_v14, %s665_s29 }
  0xf4   :  { %510 = vrot.lane.b32.xlu0 %v201_v11, %s664_s28 }
  0xf5   :  { %v501_v34 = vpop.permute.xlu1 %500  ;;  %v503_v35 = vpop.permute.xlu2 %502 }
  0xf6   :  { %588 = vst.msk [vmem:[%s1313_s4 + $0x40] sm:$0xff] %vm451_vm2, %v501_v34  ;;  %v356_v37 = vpop.permute.xlu0 %355 }
  0xf7   :  { %589 = vst.msk [vmem:[%s1313_s4 + $0x48] sm:$0xff] %vm451_vm2, %v503_v35 }
  0xf8   :  { %452 = vst.msk [vmem:[%s1312_s3] sm:$0xff] %vm451_vm2, %v356_v37 }
  0xfb   :  { %512 = vrot.lane.b32.xlu1 %v954_v16, %s664_s28  ;;  %526 = vrot.lane.b32.xlu2 %v225_v17, %s664_s28 }
  0xfc   :  { %397 = vrot.lane.b32.xlu0 %v225_v17, %s665_s29 }
  0xfd   :  { %v388_v40 = vpop.permute.xlu1 %387  ;;  %v390_v41 = vpop.permute.xlu2 %389 }
  0xfe   :  { %468 = vst.msk [vmem:[%s1312_s3 + $0x80] sm:$0xff] %vm451_vm2, %v388_v40  ;;  %v404_v42 = vpop.permute.xlu0 %403 }
  0xff   :  { %469 = vst.msk [vmem:[%s1312_s3 + $0x88] sm:$0xff] %vm451_vm2, %v390_v41 }
 0x100   :  { %476 = vst.msk [vmem:[%s1312_s3 + $0xc0] sm:$0xff] %vm451_vm2, %v404_v42 }
 0x103   :  { %399 = vrot.lane.b32.xlu1 %v973_v21, %s665_s29  ;;  %383 = vrot.lane.b32.xlu2 %v954_v16, %s665_s29 }
 0x104   :  { %367 = vrot.lane.b32.xlu0 %v180_v23, %s665_s29 }
 0x105   :  { %v406_v43 = vpop.permute.xlu1 %405  ;;  %v408_v44 = vpop.permute.xlu2 %407 }
 0x106   :  { %477 = vst.msk [vmem:[%s1312_s3 + $0xc8] sm:$0xff] %vm451_vm2, %v406_v43  ;;  %v517_v45 = vpop.permute.xlu0 %516 }
 0x107   :  { %478 = vst.msk [vmem:[%s1312_s3 + $0xd0] sm:$0xff] %vm451_vm2, %v408_v44 }
 0x108   :  { %596 = vst.msk [vmem:[%s1313_s4 + $0x80] sm:$0xff] %vm451_vm2, %v517_v45 }
 0x10b   :  { %496 = vrot.lane.b32.xlu2 %v180_v23, %s664_s28  ;;  %369 = vrot.lane.b32.xlu1 %v996_v27, %s665_s29 }
 0x10c   :  { %415 = vrot.lane.b32.xlu0 %v992_v26, %s665_s29 }
 0x10d   :  { %v519_v46 = vpop.permute.xlu1 %518  ;;  %v521_v47 = vpop.permute.xlu2 %520 }
 0x10e   :  { %597 = vst.msk [vmem:[%s1313_s4 + $0x88] sm:$0xff] %vm451_vm2, %v519_v46  ;;  %v358_v48 = vpop.permute.xlu0 %357 }
 0x10f   :  { %598 = vst.msk [vmem:[%s1313_s4 + $0x90] sm:$0xff] %vm451_vm2, %v521_v47 }
 0x110   :  { %453 = vst.msk [vmem:[%s1312_s3 + $0x8] sm:$0xff] %vm451_vm2, %v358_v48 }
 0x113   :  { %514 = vrot.lane.b32.xlu2 %v207_v33, %s664_s28  ;;  %417 = vrot.lane.b32.xlu1 %v1015_v31, %s665_s29 }
 0x114   :  { %528 = vrot.lane.b32.xlu0 %v973_v21, %s664_s28 }
 0x115   :  { %v378_v49 = vpop.permute.xlu2 %377  ;;  %v360_v50 = vpop.permute.xlu1 %359 }
 0x116   :  { %463 = vst.msk [vmem:[%s1312_s3 + $0x58] sm:$0xff] %vm451_vm2, %v378_v49  ;;  %v374_v51 = vpop.permute.xlu0 %373 }
 0x117   :  { %461 = vst.msk [vmem:[%s1312_s3 + $0x48] sm:$0xff] %vm451_vm2, %v374_v51 }
 0x118   :  { %454 = vst.msk [vmem:[%s1312_s3 + $0x10] sm:$0xff] %vm451_vm2, %v360_v50 }
 0x11b   :  { %401 = vrot.lane.b32.xlu2 %v231_v38, %s665_s29  ;;  %530 = vrot.lane.b32.xlu1 %v231_v38, %s664_s28 }
 0x11c   :  { %385 = vrot.lane.b32.xlu0 %v207_v33, %s665_s29 }
 0x11d   :  { %v376_v52 = vpop.permute.xlu1 %375  ;;  %v491_v53 = vpop.permute.xlu2 %490 }
 0x11e   :  { %v487_v54 = vpop.permute.xlu0 %486  ;;  %462 = vst.msk [vmem:[%s1312_s3 + $0x50] sm:$0xff] %vm451_vm2, %v376_v52 }
 0x11f   :  { %581 = vst.msk [vmem:[%s1313_s4 + $0x8] sm:$0xff] %vm451_vm2, %v487_v54 }
 0x120   :  { %583 = vst.msk [vmem:[%s1313_s4 + $0x18] sm:$0xff] %vm451_vm2, %v491_v53 }
 0x123   :  { %544 = vrot.lane.b32.xlu2 %v992_v26, %s664_s28  ;;  %542 = vrot.lane.b32.xlu1 %v943_v14, %s664_s28 }
 0x124   :  { %498 = vrot.lane.b32.xlu0 %v996_v27, %s664_s28 }
 0x125   :  { %v489_v55 = vpop.permute.xlu1 %488  ;;  %v539_v56 = vpop.permute.xlu2 %538 }
 0x126   :  { %v535_v57 = vpop.permute.xlu0 %534  ;;  %582 = vst.msk [vmem:[%s1313_s4 + $0x10] sm:$0xff] %vm451_vm2, %v489_v55 }
 0x127   :  { %605 = vst.msk [vmem:[%s1313_s4 + $0xc8] sm:$0xff] %vm451_vm2, %v535_v57 }
 0x128   :  { %607 = vst.msk [vmem:[%s1313_s4 + $0xd8] sm:$0xff] %vm451_vm2, %v539_v56 }
 0x12c   :  { %546 = vrot.lane.b32.xlu0 %v1015_v31, %s664_s28 }
 0x12d   :  { %v537_v58 = vpop.permute.xlu1 %536  ;;  %v364_v59 = vpop.permute.xlu2 %363 }
 0x12e   :  { %v505_v60 = vpop.permute.xlu0 %504  ;;  %606 = vst.msk [vmem:[%s1313_s4 + $0xd0] sm:$0xff] %vm451_vm2, %v537_v58 }
 0x12f   :  { %590 = vst.msk [vmem:[%s1313_s4 + $0x50] sm:$0xff] %vm451_vm2, %v505_v60 }
 0x130   :  { %456 = vst.msk [vmem:[%s1312_s3 + $0x20] sm:$0xff] %vm451_vm2, %v364_v59 }
 0x135   :  { %v362_v61 = vpop.permute.xlu1 %361  ;;  %v509_v62 = vpop.permute.xlu2 %508 }
 0x136   :  { %v392_v63 = vpop.permute.xlu0 %391  ;;  %455 = vst.msk [vmem:[%s1312_s3 + $0x18] sm:$0xff] %vm451_vm2, %v362_v61 }
 0x137   :  { %470 = vst.msk [vmem:[%s1312_s3 + $0x90] sm:$0xff] %vm451_vm2, %v392_v63 }
 0x138   :  { %592 = vst.msk [vmem:[%s1313_s4 + $0x60] sm:$0xff] %vm451_vm2, %v509_v62 }
 0x13d   :  { %v507_v0 = vpop.permute.xlu1 %506  ;;  %v396_v1 = vpop.permute.xlu2 %395 }
 0x13e   :  { %v410_v2 = vpop.permute.xlu0 %409  ;;  %591 = vst.msk [vmem:[%s1313_s4 + $0x58] sm:$0xff] %vm451_vm2, %v507_v0 }
 0x13f   :  { %479 = vst.msk [vmem:[%s1312_s3 + $0xd8] sm:$0xff] %vm451_vm2, %v410_v2 }
 0x140   :  { %472 = vst.msk [vmem:[%s1312_s3 + $0xa0] sm:$0xff] %vm451_vm2, %v396_v1 }
 0x145   :  { %v394_v3 = vpop.permute.xlu1 %393  ;;  %v366_v4 = vpop.permute.xlu2 %365 }
 0x146   :  { %v523_v5 = vpop.permute.xlu0 %522  ;;  %471 = vst.msk [vmem:[%s1312_s3 + $0x98] sm:$0xff] %vm451_vm2, %v394_v3 }
 0x147   :  { %599 = vst.msk [vmem:[%s1313_s4 + $0x98] sm:$0xff] %vm451_vm2, %v523_v5 }
 0x148   :  { %457 = vst.msk [vmem:[%s1312_s3 + $0x28] sm:$0xff] %vm451_vm2, %v366_v4 }
 0x14d   :  { %v412_v6 = vpop.permute.xlu1 %411  ;;  %v414_v7 = vpop.permute.xlu2 %413 }
 0x14e   :  { %v380_v8 = vpop.permute.xlu0 %379  ;;  %480 = vst.msk [vmem:[%s1312_s3 + $0xe0] sm:$0xff] %vm451_vm2, %v412_v6 }
 0x14f   :  { %464 = vst.msk [vmem:[%s1312_s3 + $0x60] sm:$0xff] %vm451_vm2, %v380_v8 }
 0x150   :  { %481 = vst.msk [vmem:[%s1312_s3 + $0xe8] sm:$0xff] %vm451_vm2, %v414_v7 }
 0x155   :  { %v525_v9 = vpop.permute.xlu1 %524  ;;  %v527_v10 = vpop.permute.xlu2 %526 }
 0x156   :  { %600 = vst.msk [vmem:[%s1313_s4 + $0xa0] sm:$0xff] %vm451_vm2, %v525_v9  ;;  %v493_v11 = vpop.permute.xlu0 %492 }
 0x157   :  { %584 = vst.msk [vmem:[%s1313_s4 + $0x20] sm:$0xff] %vm451_vm2, %v493_v11 }
 0x158   :  { %601 = vst.msk [vmem:[%s1313_s4 + $0xa8] sm:$0xff] %vm451_vm2, %v527_v10 }
 0x15d   :  { %v382_v12 = vpop.permute.xlu1 %381  ;;  %v384_v13 = vpop.permute.xlu2 %383 }
 0x15e   :  { %465 = vst.msk [vmem:[%s1312_s3 + $0x68] sm:$0xff] %vm451_vm2, %v382_v12  ;;  %v541_v14 = vpop.permute.xlu0 %540 }
 0x15f   :  { %608 = vst.msk [vmem:[%s1313_s4 + $0xe0] sm:$0xff] %vm451_vm2, %v541_v14 }
 0x160   :  { %466 = vst.msk [vmem:[%s1312_s3 + $0x70] sm:$0xff] %vm451_vm2, %v384_v13 }
 0x165   :  { %v495_v15 = vpop.permute.xlu1 %494  ;;  %v497_v16 = vpop.permute.xlu2 %496 }
 0x166   :  { %v511_v17 = vpop.permute.xlu0 %510  ;;  %585 = vst.msk [vmem:[%s1313_s4 + $0x28] sm:$0xff] %vm451_vm2, %v495_v15 }
 0x167   :  { %593 = vst.msk [vmem:[%s1313_s4 + $0x68] sm:$0xff] %vm451_vm2, %v511_v17 }
 0x168   :  { %586 = vst.msk [vmem:[%s1313_s4 + $0x30] sm:$0xff] %vm451_vm2, %v497_v16 }
 0x16d   :  { %v513_v18 = vpop.permute.xlu1 %512  ;;  %v515_v19 = vpop.permute.xlu2 %514 }
 0x16e   :  { %v398_v20 = vpop.permute.xlu0 %397  ;;  %594 = vst.msk [vmem:[%s1313_s4 + $0x70] sm:$0xff] %vm451_vm2, %v513_v18 }
 0x16f   :  { %473 = vst.msk [vmem:[%s1312_s3 + $0xa8] sm:$0xff] %vm451_vm2, %v398_v20 }
 0x170   :  { %595 = vst.msk [vmem:[%s1313_s4 + $0x78] sm:$0xff] %vm451_vm2, %v515_v19 }
 0x175   :  { %v400_v21 = vpop.permute.xlu1 %399  ;;  %v402_v22 = vpop.permute.xlu2 %401 }
 0x176   :  { %474 = vst.msk [vmem:[%s1312_s3 + $0xb0] sm:$0xff] %vm451_vm2, %v400_v21  ;;  %v368_v23 = vpop.permute.xlu0 %367 }
 0x177   :  { %475 = vst.msk [vmem:[%s1312_s3 + $0xb8] sm:$0xff] %vm451_vm2, %v402_v22 }
 0x178   :  { %458 = vst.msk [vmem:[%s1312_s3 + $0x30] sm:$0xff] %vm451_vm2, %v368_v23 }
 0x17d   :  { %v545_v24 = vpop.permute.xlu2 %544  ;;  %v370_v25 = vpop.permute.xlu1 %369 }
 0x17e   :  { %610 = vst.msk [vmem:[%s1313_s4 + $0xf0] sm:$0xff] %vm451_vm2, %v545_v24  ;;  %v416_v26 = vpop.permute.xlu0 %415 }
 0x17f   :  { %482 = vst.msk [vmem:[%s1312_s3 + $0xf0] sm:$0xff] %vm451_vm2, %v416_v26 }
 0x180   :  { %459 = vst.msk [vmem:[%s1312_s3 + $0x38] sm:$0xff] %vm451_vm2, %v370_v25 }
 0x185   :  { %v418_v27 = vpop.permute.xlu1 %417 }
 0x186   :  { %v529_v28 = vpop.permute.xlu0 %528  ;;  %483 = vst.msk [vmem:[%s1312_s3 + $0xf8] sm:$0xff] %vm451_vm2, %v418_v27 }
 0x187   :  { %602 = vst.msk [vmem:[%s1313_s4 + $0xb0] sm:$0xff] %vm451_vm2, %v529_v28 }
 0x18d   :  { %v531_v29 = vpop.permute.xlu1 %530 }
 0x18e   :  { %v386_v30 = vpop.permute.xlu0 %385  ;;  %603 = vst.msk [vmem:[%s1313_s4 + $0xb8] sm:$0xff] %vm451_vm2, %v531_v29 }
 0x18f   :  { %467 = vst.msk [vmem:[%s1312_s3 + $0x78] sm:$0xff] %vm451_vm2, %v386_v30 }
 0x195   :  { %v543_v31 = vpop.permute.xlu1 %542 }
 0x196   :  { %v499_v32 = vpop.permute.xlu0 %498  ;;  %609 = vst.msk [vmem:[%s1313_s4 + $0xe8] sm:$0xff] %vm451_vm2, %v543_v31 }
 0x197   :  { %587 = vst.msk [vmem:[%s1313_s4 + $0x38] sm:$0xff] %vm451_vm2, %v499_v32 }
 0x19e   :  { %v547_v33 = vpop.permute.xlu0 %546 }
 0x19f   :  { %611 = vst.msk [vmem:[%s1313_s4 + $0xf8] sm:$0xff] %vm451_vm2, %v547_v33 }

</bundles_post_ra>
